<compile_context>
chip_gen: v6e
topology: v6e:2x2x1
jax: 0.10.0
libtpu: 0.0.40
codegen_flags: <defaults>
</compile_context>

<pallas_src>
import math

import jax
import jax.numpy as jnp
from jax import lax
from jax.experimental import pallas as pl
from jax.experimental.pallas import tpu as pltpu


def _round_up(a, m):
    return ((a + m - 1) // m) * m


def _pick_block_b(B, vmem_budget_bytes=8 << 20):
    """Lane-block size from a VMEM budget (f32, 8-sublane-padded, double-buffered)."""
    # per lane: x block (<=8 sublanes * 4B) + out block (8 sublanes * 4B), x2 buffers
    bytes_per_lane = 2 * (8 * 4 + 8 * 4)
    cap = (vmem_budget_bytes // bytes_per_lane) // 128 * 128
    cap = max(128, min(cap, 32768))  # grid-step overhead is amortized well before 32k
    bp = _round_up(B, 128)
    if bp <= 128:
        return 128
    # at least 2 grid steps so both v7x TensorCores get work (no-op on v5e/v6e)
    half = _round_up((bp + 1) // 2, 128)
    return max(128, min(cap, half))


def _critic_kernel(x_ref, w0_ref, b0_ref, w1_ref, b1_ref, o_ref):
    S, TB = x_ref.shape            # (state_dim, batch lanes in this block)
    HP = w0_ref.shape[0]           # lane-aligned hidden (128)

    w0 = w0_ref[...]               # (HP, S)  resident across grid steps
    b0 = b0_ref[...]               # (HP, 1)
    w1 = w1_ref[...]               # (HP, 1)
    b1 = b1_ref[0]                 # scalar from SMEM

    # Lane-chunk so the whole MLP for a chunk stays in vregs: no (HP, TB)
    # hidden temporary round-tripping VMEM / the single vector-store slot.
    LC = 256 if TB % 256 == 0 else 128
    n_chunks = TB // LC

    def chunk(c, carry):
        off = pl.multiple_of(c * LC, 128)
        xc = x_ref[:, pl.ds(off, LC)]                       # (S, LC)

        if S <= 8:
            # K is tiny: unrolled VPU broadcast-MACs (MXU would be <4% used
            # and still pay its fill/drain + result-FIFO latency).
            # TODO(synk): per perf review, re-benchmark an MXU dot here for
            # very large blocks on v5e (weakest VPU / 1 vst slot).
            h = b0 + w0[:, 0:1] * xc[0:1, :]                # (HP, LC)
            for k in range(1, S):
                h = h + w0[:, k:k + 1] * xc[k:k + 1, :]
        else:
            h = jnp.dot(w0, xc, preferred_element_type=jnp.float32) + b0

        h = jnp.maximum(h, 0.0)                             # ReLU

        # Single output unit: VPU multiply + XLU sublane reduction instead of
        # an N=1 MXU matmul.  Result is a lane-dense (1, LC) row.
        v = jnp.sum(h * w1, axis=0, keepdims=True)          # (1, LC)
        o_ref[:, pl.ds(off, LC)] = (v + b1).astype(o_ref.dtype)
        return carry

    lax.fori_loop(0, n_chunks, chunk, 0, unroll=n_chunks <= 8)


def critic_forward(x, w0, b0, w1, b1, *, block_b=None):
    """x: (B, S); w0: (S, H); b0: (1, H) or (H,); w1: (H, 1) or (H,); b1: 1-elem.

    Returns (B, 1) float32, identical to the PyTorch Critic.forward.
    """
    B, S = x.shape
    H = w0.shape[1]
    HP = _round_up(H, 128)                                   # 100 -> 128
    pad_h = HP - H

    x = x.astype(jnp.float32)
    w0 = w0.astype(jnp.float32)

    # Transposed, aligned parameter layouts (zero hidden padding is exact:
    # padded units are relu(0)=0 and multiply zero w1 rows).
    w0t = jnp.pad(w0.T, ((0, pad_h), (0, 0)))                               # (HP, S)
    b0c = jnp.pad(jnp.reshape(b0, (H, 1)).astype(jnp.float32), ((0, pad_h), (0, 0)))  # (HP, 1)
    w1c = jnp.pad(jnp.reshape(w1, (H, 1)).astype(jnp.float32), ((0, pad_h), (0, 0)))  # (HP, 1)
    b1s = jnp.reshape(b1, (1,)).astype(jnp.float32)                          # SMEM scalar

    if block_b is None:
        block_b = _pick_block_b(B)
    BP = _round_up(max(B, 1), block_b)                       # padded batch (lane axis)
    grid = (BP // block_b,)

    # Batch on lanes; zero-pad the extra lanes (their outputs are discarded).
    xt = jnp.transpose(x)                                    # (S, B)
    if BP != B:
        xt = jnp.pad(xt, ((0, 0), (0, BP - B)))              # (S, BP)

    cost = pl.CostEstimate(
        flops=2 * BP * S * HP + 4 * BP * HP,
        transcendentals=0,
        bytes_accessed=4 * (S * BP + HP * S + 2 * HP + 1 + BP),
    )

    out = pl.pallas_call(
        _critic_kernel,
        out_shape=jax.ShapeDtypeStruct((1, BP), jnp.float32),
        grid=grid,
        in_specs=[
            pl.BlockSpec((S, block_b), lambda i: (0, i)),    # x^T: lane-dense batch tiles
            pl.BlockSpec((HP, S), lambda i: (0, 0)),         # w0^T: resident
            pl.BlockSpec((HP, 1), lambda i: (0, 0)),         # b0:   resident
            pl.BlockSpec((HP, 1), lambda i: (0, 0)),         # w1:   resident
            pl.BlockSpec(memory_space=pltpu.MemorySpace.SMEM),  # b1: scalar in SMEM
        ],
        out_specs=pl.BlockSpec((1, block_b), lambda i: (0, i)),  # lane-dense output row
        compiler_params=pltpu.CompilerParams(
            dimension_semantics=("parallel",),               # v7x: shard batch over 2 TCs
            vmem_limit_bytes=32 * 1024 * 1024,               # explicit, fits all gens
        ),
        cost_estimate=cost,
    )(xt, w0t, b0c, w1c, b1s)

    # Free contiguous slice + reshape back to the module's (B, 1) interface.
    return out[0, :B].reshape(B, 1)


def init_critic_params(key, state_space, hidden=100):
    """Deterministic init mimicking PyTorch nn.Linear default (U[-1/sqrt(fan_in), +])."""
    k0w, k0b, k1w, k1b = jax.random.split(key, 4)
    bound0 = 1.0 / math.sqrt(state_space)
    bound1 = 1.0 / math.sqrt(hidden)
    # Stored directly in (in, out) layout == transpose of PyTorch's (out, in).
    w0 = jax.random.uniform(k0w, (state_space, hidden), jnp.float32, -bound0, bound0)
    b0 = jax.random.uniform(k0b, (1, hidden), jnp.float32, -bound0, bound0)
    w1 = jax.random.uniform(k1w, (hidden, 1), jnp.float32, -bound1, bound1)
    b1 = jax.random.uniform(k1b, (1, 1), jnp.float32, -bound1, bound1)
    return w0, b0, w1, b1


if __name__ == "__main__":
    key = jax.random.PRNGKey(0)
    k_params, k_x = jax.random.split(key)

    batch = 8
    state_space = 4   # cartpole observation dim
    hidden = 100

    w0, b0, w1, b1 = init_critic_params(k_params, state_space, hidden)
    x = jax.random.normal(k_x, (batch, state_space), jnp.float32)

    out = critic_forward(x, w0, b0, w1, b1)
    jax.block_until_ready(out)

    # Reference check in plain JAX (same math as the PyTorch forward), using
    # the original *unpadded* parameters.
    ref = jnp.maximum(x @ w0 + b0, 0.0) @ w1 + b1
    assert out.shape == (batch, 1)
    assert jnp.allclose(out, ref, atol=1e-5, rtol=1e-5)

    print("KERNEL_OK")
</pallas_src>

<mosaic_0001>
module attributes {stable_mosaic.version = 11 : i64} {
  func.func @_critic_kernel(%arg0: i32, %arg1: memref<4x128xf32, #tpu.memory_space<vmem>>, %arg2: memref<128x4xf32, #tpu.memory_space<vmem>>, %arg3: memref<128x1xf32, #tpu.memory_space<vmem>>, %arg4: memref<128x1xf32, #tpu.memory_space<vmem>>, %arg5: memref<1xf32, #tpu.memory_space<smem>>, %arg6: memref<1x128xf32, #tpu.memory_space<vmem>>) attributes {dimension_semantics = [#tpu.dimension_semantics<parallel>], iteration_bounds = array<i64: 1>, scalar_prefetch = 0 : i64, scratch_operands = 0 : i64, tpu.core_type = #tpu.core_type<tc>, window_params = [{transform_indices = @transform_0, window_bounds = array<i64: 4, 128>}, {pipeline_mode = #tpu.pipeline_mode<synchronous>, transform_indices = @transform_1, window_bounds = array<i64: 128, 4>}, {pipeline_mode = #tpu.pipeline_mode<synchronous>, transform_indices = @transform_2, window_bounds = array<i64: 128, 1>}, {pipeline_mode = #tpu.pipeline_mode<synchronous>, transform_indices = @transform_3, window_bounds = array<i64: 128, 1>}, {transform_indices = @transform_4, window_bounds = array<i64: 1>}, {transform_indices = @transform_5, window_bounds = array<i64: 1, 128>}]} {
    %c0 = arith.constant 0 : index
    %c0_0 = arith.constant 0 : index
    %0 = vector.load %arg2[%c0, %c0_0] : memref<128x4xf32, #tpu.memory_space<vmem>>, vector<128x4xf32>
    %c0_1 = arith.constant 0 : index
    %c0_2 = arith.constant 0 : index
    %1 = vector.load %arg3[%c0_1, %c0_2] : memref<128x1xf32, #tpu.memory_space<vmem>>, vector<128x1xf32>
    %c0_3 = arith.constant 0 : index
    %c0_4 = arith.constant 0 : index
    %2 = vector.load %arg4[%c0_3, %c0_4] : memref<128x1xf32, #tpu.memory_space<vmem>>, vector<128x1xf32>
    %c0_5 = arith.constant 0 : index
    %3 = memref.load %arg5[%c0_5] : memref<1xf32, #tpu.memory_space<smem>>
    %c0_i32 = arith.constant 0 : i32
    %c128_i32 = arith.constant 128 : i32
    %4 = arith.muli %c0_i32, %c128_i32 : i32
    %5 = tpu.assume_multiple %4, 128 : i32
    %c0_6 = arith.constant 0 : index
    %6 = arith.index_cast %5 : i32 to index
    %7 = vector.load %arg1[%c0_6, %6] : memref<4x128xf32, #tpu.memory_space<vmem>>, vector<4x128xf32>
    %8 = vector.extract_strided_slice %0 {offsets = [0, 0], sizes = [128, 1], strides = [1, 1]} : vector<128x4xf32> to vector<128x1xf32>
    %9 = vector.extract_strided_slice %7 {offsets = [0, 0], sizes = [1, 128], strides = [1, 1]} : vector<4x128xf32> to vector<1x128xf32>
    %10 = vector.broadcast %8 : vector<128x1xf32> to vector<128x128xf32>
    %11 = vector.broadcast %9 : vector<1x128xf32> to vector<128x128xf32>
    %12 = arith.mulf %10, %11 : vector<128x128xf32>
    %13 = vector.broadcast %1 : vector<128x1xf32> to vector<128x128xf32>
    %14 = arith.addf %13, %12 : vector<128x128xf32>
    %15 = vector.extract_strided_slice %0 {offsets = [0, 1], sizes = [128, 1], strides = [1, 1]} : vector<128x4xf32> to vector<128x1xf32>
    %16 = vector.extract_strided_slice %7 {offsets = [1, 0], sizes = [1, 128], strides = [1, 1]} : vector<4x128xf32> to vector<1x128xf32>
    %17 = vector.broadcast %15 : vector<128x1xf32> to vector<128x128xf32>
    %18 = vector.broadcast %16 : vector<1x128xf32> to vector<128x128xf32>
    %19 = arith.mulf %17, %18 : vector<128x128xf32>
    %20 = arith.addf %14, %19 : vector<128x128xf32>
    %21 = vector.extract_strided_slice %0 {offsets = [0, 2], sizes = [128, 1], strides = [1, 1]} : vector<128x4xf32> to vector<128x1xf32>
    %22 = vector.extract_strided_slice %7 {offsets = [2, 0], sizes = [1, 128], strides = [1, 1]} : vector<4x128xf32> to vector<1x128xf32>
    %23 = vector.broadcast %21 : vector<128x1xf32> to vector<128x128xf32>
    %24 = vector.broadcast %22 : vector<1x128xf32> to vector<128x128xf32>
    %25 = arith.mulf %23, %24 : vector<128x128xf32>
    %26 = arith.addf %20, %25 : vector<128x128xf32>
    %27 = vector.extract_strided_slice %0 {offsets = [0, 3], sizes = [128, 1], strides = [1, 1]} : vector<128x4xf32> to vector<128x1xf32>
    %28 = vector.extract_strided_slice %7 {offsets = [3, 0], sizes = [1, 128], strides = [1, 1]} : vector<4x128xf32> to vector<1x128xf32>
    %29 = vector.broadcast %27 : vector<128x1xf32> to vector<128x128xf32>
    %30 = vector.broadcast %28 : vector<1x128xf32> to vector<128x128xf32>
    %31 = arith.mulf %29, %30 : vector<128x128xf32>
    %32 = arith.addf %26, %31 : vector<128x128xf32>
    %cst = arith.constant 0.000000e+00 : f32
    %33 = vector.broadcast %cst : f32 to vector<128x128xf32>
    %34 = arith.maximumf %32, %33 : vector<128x128xf32>
    %35 = vector.broadcast %2 : vector<128x1xf32> to vector<128x128xf32>
    %36 = arith.mulf %34, %35 : vector<128x128xf32>
    %cst_7 = arith.constant dense<0.000000e+00> : vector<128xf32>
    %37 = vector.multi_reduction <add>, %36, %cst_7 [0] : vector<128x128xf32> to vector<128xf32>
    %38 = vector.shape_cast %37 : vector<128xf32> to vector<1x128xf32>
    %39 = vector.broadcast %3 : f32 to vector<1x128xf32>
    %40 = arith.addf %38, %39 : vector<1x128xf32>
    %c0_8 = arith.constant 0 : index
    %41 = arith.index_cast %5 : i32 to index
    %42 = vector.load %arg6[%c0_8, %41] : memref<1x128xf32, #tpu.memory_space<vmem>>, vector<1x128xf32>
    tpu.vector_store %arg6[%c0_8, %41], %40 {strides = array<i32>} : memref<1x128xf32, #tpu.memory_space<vmem>>, vector<1x128xf32>,
    %c1_i32 = arith.constant 1 : i32
    return
  }
  func.func @transform_0(%arg0: i32) -> (i32, i32) {
    %c0_i32 = arith.constant 0 : i32
    %c0_i32_0 = arith.constant 0 : i32
    return %c0_i32, %arg0 : i32, i32
  }
  func.func @transform_1(%arg0: i32) -> (i32, i32) {
    %c0_i32 = arith.constant 0 : i32
    %c0_i32_0 = arith.constant 0 : i32
    %c0_i32_1 = arith.constant 0 : i32
    return %c0_i32, %c0_i32_0 : i32, i32
  }
  func.func @transform_2(%arg0: i32) -> (i32, i32) {
    %c0_i32 = arith.constant 0 : i32
    %c0_i32_0 = arith.constant 0 : i32
    %c0_i32_1 = arith.constant 0 : i32
    return %c0_i32, %c0_i32_0 : i32, i32
  }
  func.func @transform_3(%arg0: i32) -> (i32, i32) {
    %c0_i32 = arith.constant 0 : i32
    %c0_i32_0 = arith.constant 0 : i32
    %c0_i32_1 = arith.constant 0 : i32
    return %c0_i32, %c0_i32_0 : i32, i32
  }
  func.func @transform_4(%arg0: i32) -> i32 {
    %c0_i32 = arith.constant 0 : i32
    %c0_i32_0 = arith.constant 0 : i32
    return %c0_i32 : i32
  }
  func.func @transform_5(%arg0: i32) -> (i32, i32) {
    %c0_i32 = arith.constant 0 : i32
    %c0_i32_0 = arith.constant 0 : i32
    return %c0_i32, %arg0 : i32, i32
  }
}

</mosaic_0001>

<bundles_post_ra>
// kernel: tpu_custom_call.1
= control target key start
LH: loop header
LB: loop body
LE: loop exit
PB: predicated region body
PF: predicated region fallthrough
CT: control target
= control target key end

     0   :  { %v756_v2 = vmov 1   ;;  %v757_v3 = vmov 0   ;;  %s1251_s0 = inlined_call_operand.vmem [shape: f32[4,128], index: 0, kind: input, shape index: {}]   ;;  %s1252_s1 = inlined_call_operand.vmem [shape: f32[128,4], index: 1, kind: input, shape index: {}]   ;;  %s1253_s2 = inlined_call_operand.vmem [shape: f32[128,1], index: 2, kind: input, shape index: {}]   ;;  %s1254_s3 = inlined_call_operand.vmem [shape: f32[128,1], index: 3, kind: input, shape index: {}]   ;;  %s1255_s4 = inlined_call_operand.<no memory space> [shape: f32[1], index: 4, kind: input, shape index: {}]   ;;  %s1256_s5 = inlined_call_operand.hbm [shape: f32[1,128], index: 5, kind: output, shape index: {}]  }
   0x1   :  { %v794_v0 = vld [vmem:[%s1252_s1 + $0x10] sm:$0xff]  ;;  %v799_v1 = vld [vmem:[%s1252_s1] sm:$0xff]  ;;  %724 = vset.pattern.permute.xlu0 %v756_v2  ;;  %723 = vset.pattern.permute.xlu1 %v757_v3  ;;  %v807_v4 = vld [vmem:[%s1252_s1 + $0x18] sm:$0xff] }
   0x2   :  { %84 = vperm.xlu1 %723, %v794_v0   ;;  %269 = vperm.xlu0 %724, %v799_v1   ;;  %v814_v5 = vld [vmem:[%s1252_s1 + $0x28] sm:$0xff]  ;;  %v821_v6 = vld [vmem:[%s1252_s1 + $0x38] sm:$0xff] }
   0x6   :  { %89 = vperm.xlu1 %723, %v807_v4   ;;  %281 = vperm.xlu0 %724, %v807_v4  }
   0xa   :  { %99 = vperm.xlu1 %723, %v814_v5   ;;  %289 = vperm.xlu0 %724, %v814_v5  }
   0xb   :  { %11 = vsyncpa [#allocation4], 0  ;;  %v828_v7 = vld [vmem:[%s1252_s1 + $0x48] sm:$0xff]  ;;  %v835_v8 = vld [vmem:[%s1252_s1 + $0x58] sm:$0xff]  ;;  %v758_v13 = vmov 2   ;;  %v759_v27 = vmov 3   ;;  %v152_v51 = vlaneseq }
   0xc   :  { %v842_v9 = vld [vmem:[%s1252_s1 + $0x68] sm:$0xff]  ;;  %v849_v10 = vld [vmem:[%s1252_s1 + $0x78] sm:$0xff]  ;;  %v868_v15 = vld [vmem:[%s1252_s1 + $0x20] sm:$0xff]  ;;  %s760_s12 = smov [#allocation3]  }
   0xd   :  { %v39_v11 = vld [vmem:[%s1253_s2 + $0x8] sm:$0xff]  ;;  %v41_v14 = vld [vmem:[%s1253_s2 + $0x18] sm:$0xff]  ;;  %v877_v17 = vld [vmem:[%s1252_s1 + $0x30] sm:$0xff]  ;;  %v1004_v56 = vshrl.u32 %v152_v51, 7  ;;  %s710_s13 = sshll.u32 %s760_s12, 4  ;;  %s711_s13 = int_to_ptr.vmem [resolvable:$true] %s710_s13 }
   0xe   :  { %109 = vperm.xlu1 %723, %v821_v6   ;;  %297 = vperm.xlu0 %724, %v821_v6   ;;  %v859_v12 = vld [vmem:[%s1252_s1 + $0x8] sm:$0xff]  ;;  %v45_v18 = vld [vmem:[%s1253_s2 + $0x38] sm:$0xff]  ;;  %v886_v19 = vld [vmem:[%s1252_s1 + $0x40] sm:$0xff]  ;;  %s734_s14 = scalar_lea.vmem %s711_s13, 16  ;;  %s738_s15 = scalar_lea.vmem %s711_s13, 32 }
   0xf   :  { %v43_v16 = vld [vmem:[%s1253_s2 + $0x28] sm:$0xff]  ;;  %v895_v21 = vld [vmem:[%s1252_s1 + $0x50] sm:$0xff]  ;;  %v49_v22 = vld [vmem:[%s1253_s2 + $0x58] sm:$0xff]  ;;  %v154_v60 = vsub.s32 0, %v1004_v56  ;;  %v334_v61 = vsub.s32 1, %v1004_v56  ;;  %p735_p0 = scmp.ne.s32.totalorder %s711_s13, %s734_s14  ;;  %p739_p1 = scmp.lt.s32.totalorder %s711_s13, %s711_s13 }
  0x10   :  { %v47_v20 = vld [vmem:[%s1253_s2 + $0x48] sm:$0xff]  ;;  %v904_v23 = vld [vmem:[%s1252_s1 + $0x60] sm:$0xff]  ;;  %v913_v25 = vld [vmem:[%s1252_s1 + $0x70] sm:$0xff]  ;;  %p740_p2 = scmp.lt.s32.totalorder %s738_s15, %s734_s14 }
  0x11   :  { %v51_v24 = vld [vmem:[%s1253_s2 + $0x68] sm:$0xff]  ;;  %v53_v26 = vld [vmem:[%s1253_s2 + $0x78] sm:$0xff]  ;;  %v38_v28 = vld [vmem:[%s1253_s2] sm:$0xff] }
  0x12   :  { %119 = vperm.xlu1 %723, %v828_v7   ;;  %305 = vperm.xlu0 %724, %v828_v7   ;;  %v40_v29 = vld [vmem:[%s1253_s2 + $0x10] sm:$0xff]  ;;  %v42_v30 = vld [vmem:[%s1253_s2 + $0x20] sm:$0xff]  ;;  %v57_v48 = vld [vmem:[%s1254_s3 + $0x18] sm:$0xff]  ;;  %p741_p3 = por %p740_p2, %p739_p1 }
  0x13   :  { %v44_v31 = vld [vmem:[%s1253_s2 + $0x30] sm:$0xff]  ;;  %v46_v32 = vld [vmem:[%s1253_s2 + $0x40] sm:$0xff]  ;;  %v55_v53 = vld [vmem:[%s1254_s3 + $0x8] sm:$0xff] }
  0x14   :  { %v48_v33 = vld [vmem:[%s1253_s2 + $0x50] sm:$0xff]  ;;  %v50_v36 = vld [vmem:[%s1253_s2 + $0x60] sm:$0xff]  ;;  %v59_v57 = vld [vmem:[%s1254_s3 + $0x28] sm:$0xff]  ;;  %p742_p4 = pnand %p741_p3, %p735_p0 }
  0x15   :  { %v52_v39 = vld [vmem:[%s1253_s2 + $0x70] sm:$0xff]  ;;  %v54_v42 = vld [vmem:[%s1254_s3] sm:$0xff] }
  0x16   :  { %129 = vperm.xlu1 %723, %v835_v8   ;;  %313 = vperm.xlu0 %724, %v835_v8   ;;  %v56_v45 = vld [vmem:[%s1254_s3 + $0x10] sm:$0xff]  ;;  %v58_v52 = vld [vmem:[%s1254_s3 + $0x20] sm:$0xff] }
  0x17   :  { %v60_v62 = vld [vmem:[%s1254_s3 + $0x30] sm:$0xff]  ;;  %v1022_v63 = vld [vmem:[%s1251_s0] sm:$0xf] }
  0x1a   :  { %139 = vperm.xlu1 %723, %v842_v9   ;;  %321 = vperm.xlu0 %724, %v842_v9  }
  0x1e   :  { %149 = vperm.xlu1 %723, %v849_v10   ;;  %329 = vperm.xlu0 %724, %v849_v10  }
  0x22   :  { %179 = vperm.xlu1 %723, %v39_v11   ;;  %727 = vset.pattern.permute.xlu0 %v758_v13  ;;  %v61_v11 = vld [vmem:[%s1254_s3 + $0x38] sm:$0xff] }
  0x23   :  { %373 = vperm.xlu0 %727, %v859_v12  }
  0x26   :  { %189 = vperm.xlu1 %723, %v41_v14  }
  0x27   :  { %385 = vperm.xlu0 %727, %v868_v15  }
  0x2a   :  { %199 = vperm.xlu1 %723, %v43_v16   ;;  %v62_v16 = vld [vmem:[%s1254_s3 + $0x40] sm:$0xff] }
  0x2b   :  { %393 = vperm.xlu0 %727, %v877_v17  }
  0x2e   :  { %209 = vperm.xlu1 %723, %v45_v18  }
  0x2f   :  { %401 = vperm.xlu0 %727, %v886_v19  }
  0x32   :  { %219 = vperm.xlu1 %723, %v47_v20  }
  0x33   :  { %409 = vperm.xlu0 %727, %v895_v21  }
  0x36   :  { %229 = vperm.xlu1 %723, %v49_v22  }
  0x37   :  { %417 = vperm.xlu0 %727, %v904_v23  }
  0x3a   :  { %239 = vperm.xlu1 %723, %v51_v24  }
  0x3b   :  { %425 = vperm.xlu0 %727, %v913_v25  }
  0x3e   :  { %249 = vperm.xlu1 %723, %v53_v26  }
  0x3f   :  { %728 = vset.pattern.permute.xlu0 %v759_v27 }
  0x40   :  { %469 = vperm.xlu0 %728, %v799_v1  }
  0x42   :  { %725 = vset.pattern.permute.xlu1 %v756_v2  ;;  %v1031_v2 = vrot.slane %v1022_v63, %v334_v61 }
  0x43   :  { %273 = vperm.xlu1 %725, %v859_v12  }
  0x44   :  { %481 = vperm.xlu0 %728, %v807_v4  }
  0x47   :  { %277 = vperm.xlu1 %725, %v794_v0  }
  0x48   :  { %730 = vset.pattern.permute.xlu0 %v757_v3 }
  0x49   :  { %74 = vperm.xlu0 %730, %v799_v1  }
  0x4b   :  { %285 = vperm.xlu1 %725, %v868_v15  }
  0x4d   :  { %79 = vperm.xlu0 %730, %v859_v12  }
  0x4f   :  { %293 = vperm.xlu1 %725, %v877_v17  }
  0x51   :  { %94 = vperm.xlu0 %730, %v868_v15  }
  0x53   :  { %301 = vperm.xlu1 %725, %v886_v19  }
  0x55   :  { %104 = vperm.xlu0 %730, %v877_v17  }
  0x57   :  { %309 = vperm.xlu1 %725, %v895_v21  }
  0x59   :  { %114 = vperm.xlu0 %730, %v886_v19  }
  0x5b   :  { %317 = vperm.xlu1 %725, %v904_v23  }
  0x5d   :  { %124 = vperm.xlu0 %730, %v895_v21  }
  0x5f   :  { %325 = vperm.xlu1 %725, %v913_v25  }
  0x61   :  { %134 = vperm.xlu0 %730, %v904_v23  }
  0x63   :  { %726 = vset.pattern.permute.xlu1 %v758_v13 }
  0x64   :  { %369 = vperm.xlu1 %726, %v799_v1   ;;  %v1028_v1 = vrot.slane %v1022_v63, %v154_v60 }
  0x65   :  { %144 = vperm.xlu0 %730, %v913_v25  }
  0x68   :  { %377 = vperm.xlu1 %726, %v794_v0  }
  0x69   :  { %174 = vperm.xlu0 %730, %v38_v28  }
  0x6c   :  { %381 = vperm.xlu1 %726, %v807_v4  }
  0x6d   :  { %184 = vperm.xlu0 %730, %v40_v29  }
  0x70   :  { %389 = vperm.xlu1 %726, %v814_v5  }
  0x71   :  { %194 = vperm.xlu0 %730, %v42_v30  }
  0x74   :  { %397 = vperm.xlu1 %726, %v821_v6  }
  0x75   :  { %204 = vperm.xlu0 %730, %v44_v31  }
  0x78   :  { %405 = vperm.xlu1 %726, %v828_v7  }
  0x79   :  { %214 = vperm.xlu0 %730, %v46_v32  }
  0x7c   :  { %413 = vperm.xlu1 %726, %v835_v8  }
  0x7d   :  { %v964_v34 = vpop.permute.xlu1 %84  ;;  %224 = vperm.xlu0 %730, %v48_v33   ;;  %v966_v35 = vpop.permute.xlu0 %269  ;;  %v64_v33 = vld [vmem:[%s1254_s3 + $0x50] sm:$0xff] }
  0x80   :  { %421 = vperm.xlu1 %726, %v842_v9  }
  0x81   :  { %v90_v37 = vpop.permute.xlu1 %89  ;;  %234 = vperm.xlu0 %730, %v50_v36   ;;  %v282_v38 = vpop.permute.xlu0 %281 }
  0x82   :  { %v339_v13 = vmul.f32 %v1031_v2, %v282_v38 }
  0x84   :  { %429 = vperm.xlu1 %726, %v849_v10  }
  0x85   :  { %v100_v40 = vpop.permute.xlu1 %99  ;;  %244 = vperm.xlu0 %730, %v52_v39   ;;  %v290_v41 = vpop.permute.xlu0 %289 }
  0x86   :  { %v161_v18 = vmul.f32 %v1028_v1, %v100_v40  ;;  %v341_v22 = vmul.f32 %v1031_v2, %v290_v41  ;;  %v65_v41 = vld [vmem:[%s1254_s3 + $0x58] sm:$0xff] }
  0x88   :  { %729 = vset.pattern.permute.xlu1 %v759_v27 }
  0x89   :  { %v110_v43 = vpop.permute.xlu1 %109  ;;  %473 = vperm.xlu1 %729, %v859_v12   ;;  %586 = vperm.xlu0 %730, %v54_v42   ;;  %v298_v44 = vpop.permute.xlu0 %297  ;;  %v159_v12 = vmul.f32 %v1028_v1, %v90_v37 }
  0x8a   :  { %v163_v28 = vmul.f32 %v1028_v1, %v110_v43  ;;  %v343_v30 = vmul.f32 %v1031_v2, %v298_v44 }
  0x8d   :  { %v120_v46 = vpop.permute.xlu1 %119  ;;  %477 = vperm.xlu1 %729, %v794_v0   ;;  %596 = vperm.xlu0 %730, %v56_v45   ;;  %v306_v47 = vpop.permute.xlu0 %305 }
  0x8e   :  { %v165_v36 = vmul.f32 %v1028_v1, %v120_v46  ;;  %v345_v38 = vmul.f32 %v1031_v2, %v306_v47  ;;  %v66_v47 = vld [vmem:[%s1254_s3 + $0x60] sm:$0xff] }
  0x91   :  { %v988_v49 = vpop.permute.xlu1 %129  ;;  %485 = vperm.xlu1 %729, %v868_v15   ;;  %601 = vperm.xlu0 %730, %v57_v48   ;;  %v991_v50 = vpop.permute.xlu0 %313 }
  0x92   :  { %v347_v44 = vmul.f32 %v1031_v2, %v991_v50 }
  0x95   :  { %v999_v54 = vpop.permute.xlu1 %139  ;;  %731 = vset.pattern.permute.xlu1 %v757_v3  ;;  %606 = vperm.xlu0 %730, %v58_v52   ;;  %v1002_v55 = vpop.permute.xlu0 %321  ;;  %v68_v52 = vld [vmem:[%s1254_s3 + $0x70] sm:$0xff] }
  0x96   :  { %591 = vperm.xlu1 %731, %v55_v53   ;;  %v349_v51 = vmul.f32 %v1031_v2, %v1002_v55 }
  0x99   :  { %v1009_v58 = vpop.permute.xlu1 %149  ;;  %611 = vperm.xlu0 %730, %v59_v57   ;;  %v1011_v59 = vpop.permute.xlu0 %329 }
  0x9a   :  { %732 = vset.pattern.permute.xlu1 %v759_v27  ;;  %v63_v27 = vld [vmem:[%s1254_s3 + $0x48] sm:$0xff]  ;;  %v351_v60 = vmul.f32 %v1031_v2, %v1011_v59 }
  0x9b   :  { %489 = vperm.xlu1 %732, %v814_v5   ;;  %v67_v59 = vld [vmem:[%s1254_s3 + $0x68] sm:$0xff] }
  0x9d   :  { %v1025_v0 = vpop.permute.xlu1 %179  ;;  %616 = vperm.xlu0 %730, %v60_v62  }
  0x9e   :  { %v1033_v4 = vpop.permute.xlu0 %373 }
  0x9f   :  { %493 = vperm.xlu1 %732, %v877_v17  }
  0xa1   :  { %v190_v5 = vpop.permute.xlu1 %189  ;;  %621 = vperm.xlu0 %730, %v61_v11  }
  0xa2   :  { %v255_v14 = vadd.f32 %v190_v5, %v159_v12  ;;  %v1041_v15 = vpop.permute.xlu0 %385  ;;  %v434_v5 = vsub.s32 2, %v1004_v56 }
  0xa3   :  { %497 = vperm.xlu1 %732, %v821_v6  }
  0xa4   :  { %v1048_v20 = vadd.f32 %v339_v13, %v255_v14  ;;  %v1120_v14 = vrot.slane %v1022_v63, %v434_v5 }
  0xa5   :  { %v200_v17 = vpop.permute.xlu1 %199  ;;  %626 = vperm.xlu0 %730, %v62_v16  }
  0xa6   :  { %v257_v24 = vadd.f32 %v200_v17, %v161_v18  ;;  %v1051_v26 = vpop.permute.xlu0 %393 }
  0xa7   :  { %501 = vperm.xlu1 %732, %v886_v19  }
  0xa8   :  { %v1058_v6 = vadd.f32 %v341_v22, %v257_v24 }
  0xa9   :  { %v210_v29 = vpop.permute.xlu1 %209  ;;  %631 = vperm.xlu0 %730, %v63_v27  }
  0xaa   :  { %v259_v31 = vadd.f32 %v210_v29, %v163_v28  ;;  %v1061_v32 = vpop.permute.xlu0 %401 }
  0xab   :  { %505 = vperm.xlu1 %732, %v828_v7   ;;  %v167_v7 = vmul.f32 %v1028_v1, %v988_v49 }
  0xac   :  { %v1068_v19 = vadd.f32 %v343_v30, %v259_v31 }
  0xad   :  { %v220_v37 = vpop.permute.xlu1 %219  ;;  %636 = vperm.xlu0 %730, %v64_v33  }
  0xae   :  { %v261_v39 = vadd.f32 %v220_v37, %v165_v36  ;;  %v1071_v40 = vpop.permute.xlu0 %409 }
  0xaf   :  { %509 = vperm.xlu1 %732, %v895_v21   ;;  %v169_v21 = vmul.f32 %v1028_v1, %v999_v54 }
  0xb0   :  { %v1079_v42 = vadd.f32 %v345_v38, %v261_v39 }
  0xb1   :  { %v230_v43 = vpop.permute.xlu1 %229  ;;  %641 = vperm.xlu0 %730, %v65_v41  }
  0xb2   :  { %v263_v45 = vadd.f32 %v230_v43, %v167_v7  ;;  %v1083_v46 = vpop.permute.xlu0 %417 }
  0xb3   :  { %513 = vperm.xlu1 %732, %v835_v8   ;;  %v171_v8 = vmul.f32 %v1028_v1, %v1009_v58 }
  0xb4   :  { %v1091_v48 = vadd.f32 %v347_v44, %v263_v45  ;;  %v336_v44 = vmul.f32 %v1031_v2, %v966_v35 }
  0xb5   :  { %v240_v49 = vpop.permute.xlu1 %239  ;;  %646 = vperm.xlu0 %730, %v66_v47  }
  0xb6   :  { %v265_v50 = vadd.f32 %v240_v49, %v169_v21  ;;  %v1098_v53 = vpop.permute.xlu0 %425 }
  0xb7   :  { %517 = vperm.xlu1 %732, %v904_v23  }
  0xb8   :  { %v1103_v54 = vadd.f32 %v349_v51, %v265_v50 }
  0xb9   :  { %v250_v57 = vpop.permute.xlu1 %249  ;;  %656 = vperm.xlu0 %730, %v68_v52  }
  0xba   :  { %v267_v55 = vadd.f32 %v250_v57, %v171_v8 }
  0xbb   :  { %521 = vperm.xlu1 %732, %v842_v9   ;;  %v470_v61 = vpop.permute.xlu0 %469 }
  0xbc   :  { %v1108_v62 = vadd.f32 %v351_v60, %v267_v55 }
  0xbe   :  { %v274_v11 = vpop.permute.xlu1 %273 }
  0xbf   :  { %525 = vperm.xlu1 %732, %v913_v25   ;;  %v482_v23 = vpop.permute.xlu0 %481  ;;  %v337_v18 = vmul.f32 %v1031_v2, %v274_v11 }
  0xc2   :  { %v1111_v12 = vpop.permute.xlu1 %277 }
  0xc3   :  { %529 = vperm.xlu1 %732, %v849_v10   ;;  %v69_v10 = vld [vmem:[%s1254_s3 + $0x78] sm:$0xff] }
  0xc4   :  { %v75_v58 = vpop.permute.xlu0 %74 }
  0xc5   :  { %v156_v7 = vmul.f32 %v1028_v1, %v75_v58 }
  0xc6   :  { %v286_v13 = vpop.permute.xlu1 %285 }
  0xc7   :  { %733 = vset.pattern.permute.xlu1 %v757_v3  ;;  %v437_v3 = vmul.f32 %v1120_v14, %v1033_v4  ;;  %v340_v5 = vmul.f32 %v1031_v2, %v286_v13 }
  0xc8   :  { %651 = vperm.xlu1 %733, %v67_v59   ;;  %v80_v9 = vpop.permute.xlu0 %79 }
  0xc9   :  { %v157_v25 = vmul.f32 %v1028_v1, %v80_v9 }
  0xca   :  { %v294_v16 = vpop.permute.xlu1 %293 }
  0xcb   :  { %v253_v17 = vadd.f32 %v1025_v0, %v157_v25  ;;  %v534_v0 = vsub.s32 3, %v1004_v56 }
  0xcc   :  { %661 = vperm.xlu1 %733, %v69_v10   ;;  %v95_v22 = vpop.permute.xlu0 %94  ;;  %v342_v10 = vmul.f32 %v1031_v2, %v294_v16 }
  0xcd   :  { %v353_v24 = vadd.f32 %v337_v18, %v253_v17  ;;  %v1141_v45 = vrot.slane %v1022_v63, %v534_v0  ;;  %v160_v35 = vmul.f32 %v1028_v1, %v95_v22  ;;  %v442_v22 = vmul.f32 %v1120_v14, %v1051_v26 }
  0xce   :  { %v302_v27 = vpop.permute.xlu1 %301 }
  0xcf   :  { %v1130_v28 = vadd.f32 %v437_v3, %v353_v24  ;;  %v536_v56 = vmul.f32 %v1141_v45, %v470_v61  ;;  %v539_v57 = vmul.f32 %v1141_v45, %v482_v23  ;;  %v440_v61 = vmul.f32 %v1120_v14, %v1041_v15 }
  0xd0   :  { %v105_v29 = vpop.permute.xlu0 %104  ;;  %v344_v15 = vmul.f32 %v1031_v2, %v302_v27  ;;  %v446_v27 = vmul.f32 %v1120_v14, %v1071_v40  ;;  %v158_v40 = vmul.f32 %v1028_v1, %v964_v34 }
  0xd1   :  { %v162_v9 = vmul.f32 %v1028_v1, %v105_v29 }
  0xd2   :  { %v310_v30 = vpop.permute.xlu1 %309 }
  0xd4   :  { %v115_v31 = vpop.permute.xlu0 %114 }
  0xd5   :  { %v164_v3 = vmul.f32 %v1028_v1, %v115_v31  ;;  %v346_v31 = vmul.f32 %v1031_v2, %v310_v30  ;;  %v448_v30 = vmul.f32 %v1120_v14, %v1083_v46 }
  0xd6   :  { %v318_v33 = vpop.permute.xlu1 %317 }
  0xd8   :  { %v125_v36 = vpop.permute.xlu0 %124 }
  0xd9   :  { %v166_v16 = vmul.f32 %v1028_v1, %v125_v36  ;;  %v348_v36 = vmul.f32 %v1031_v2, %v318_v33 }
  0xda   :  { %v1132_v37 = vpop.permute.xlu1 %325 }
  0xdc   :  { %v135_v38 = vpop.permute.xlu0 %134 }
  0xdf   :  { %v370_v39 = vpop.permute.xlu1 %369 }
  0xe0   :  { %v145_v41 = vpop.permute.xlu0 %144  ;;  %v436_v21 = vmul.f32 %v1120_v14, %v370_v39 }
  0xe3   :  { %v1136_v43 = vpop.permute.xlu1 %377 }
  0xe4   :  { %v175_v4 = vpop.permute.xlu0 %174 }
  0xe5   :  { %v252_v47 = vadd.f32 %v175_v4, %v156_v7  ;;  %v444_v7 = vmul.f32 %v1120_v14, %v1061_v32 }
  0xe7   :  { %v352_v49 = vadd.f32 %v336_v44, %v252_v47  ;;  %v382_v51 = vpop.permute.xlu1 %381 }
  0xe8   :  { %v439_v50 = vmul.f32 %v1120_v14, %v382_v51  ;;  %v185_v52 = vpop.permute.xlu0 %184 }
  0xe9   :  { %v452_v8 = vadd.f32 %v436_v21, %v352_v49  ;;  %v168_v49 = vmul.f32 %v1028_v1, %v135_v38 }
  0xea   :  { %v455_v60 = vadd.f32 %v439_v50, %v1048_v20 }
  0xeb   :  { %v1149_v55 = vpop.permute.xlu1 %389  ;;  %v1151_v63 = vadd.f32 %v536_v56, %v452_v8 }
  0xec   :  { %v195_v11 = vpop.permute.xlu0 %194  ;;  %v1153_v58 = vadd.f32 %v539_v57, %v455_v60  ;;  %v170_v57 = vmul.f32 %v1028_v1, %v145_v41  ;;  %v338_v41 = vmul.f32 %v1031_v2, %v1111_v12  ;;  %v438_v1 = vmul.f32 %v1120_v14, %v1136_v43 }
  0xed   :  { %v256_v59 = vadd.f32 %v195_v11, %v160_v35  ;;  %v350_v11 = vmul.f32 %v1031_v2, %v1132_v37 }
  0xef   :  { %v356_v23 = vadd.f32 %v340_v5, %v256_v59  ;;  %v1159_v25 = vpop.permute.xlu1 %397  ;;  %v254_v59 = vadd.f32 %v185_v52, %v158_v40 }
  0xf0   :  { %v205_v20 = vpop.permute.xlu0 %204 }
  0xf1   :  { %v258_v18 = vadd.f32 %v205_v20, %v162_v9  ;;  %v456_v17 = vadd.f32 %v440_v61, %v356_v23  ;;  %v450_v61 = vmul.f32 %v1120_v14, %v1098_v53  ;;  %v354_v34 = vadd.f32 %v338_v41, %v254_v59 }
  0xf3   :  { %v358_v13 = vadd.f32 %v342_v10, %v258_v18  ;;  %v1165_v24 = vpop.permute.xlu1 %405 }
  0xf4   :  { %v215_v39 = vpop.permute.xlu0 %214 }
  0xf5   :  { %v260_v29 = vadd.f32 %v215_v39, %v164_v3  ;;  %v1168_v0 = vadd.f32 %v442_v22, %v358_v13  ;;  %v454_v22 = vadd.f32 %v438_v1, %v354_v34  ;;  %v568_v39 = vmax.f32 %v1151_v63, 0.0 }
  0xf7   :  { %v360_v4 = vadd.f32 %v344_v15, %v260_v29  ;;  %v1173_v44 = vpop.permute.xlu1 %413 }
  0xf8   :  { %v225_v26 = vpop.permute.xlu0 %224 }
  0xf9   :  { %v262_v47 = vadd.f32 %v225_v26, %v166_v16  ;;  %v1176_v21 = vadd.f32 %v444_v7, %v360_v4 }
  0xfb   :  { %v362_v51 = vadd.f32 %v346_v31, %v262_v47  ;;  %v1181_v50 = vpop.permute.xlu1 %421  ;;  %v441_v31 = vmul.f32 %v1120_v14, %v1149_v55  ;;  %v443_v55 = vmul.f32 %v1120_v14, %v1159_v25  ;;  %v445_v25 = vmul.f32 %v1120_v14, %v1165_v24 }
  0xfc   :  { %v235_v32 = vpop.permute.xlu0 %234  ;;  %v447_v24 = vmul.f32 %v1120_v14, %v1173_v44 }
  0xfd   :  { %v264_v56 = vadd.f32 %v235_v32, %v168_v49  ;;  %v1184_v8 = vadd.f32 %v446_v27, %v362_v51  ;;  %v457_v63 = vadd.f32 %v441_v31, %v1058_v6  ;;  %v459_v6 = vadd.f32 %v443_v55, %v1068_v19 }
  0xff   :  { %v364_v60 = vadd.f32 %v348_v36, %v264_v56  ;;  %v1189_v35 = vpop.permute.xlu1 %429 }
 0x100   :  { %v245_v38 = vpop.permute.xlu0 %244 }
 0x101   :  { %v266_v5 = vadd.f32 %v245_v38, %v170_v57  ;;  %v1195_v33 = vadd.f32 %v448_v30, %v364_v60 }
 0x103   :  { %v366_v46 = vadd.f32 %v350_v11, %v266_v5 }
 0x104   :  { %v474_v9 = vpop.permute.xlu1 %473  ;;  %v587_v23 = vpop.permute.xlu0 %586 }
 0x105   :  { %v1201_v20 = vadd.f32 %v450_v61, %v366_v46  ;;  %v537_v37 = vmul.f32 %v1141_v45, %v474_v9  ;;  %v664_v4 = vmul.f32 %v587_v23, %v568_v39 }
 0x107   :  { %v553_v53 = vadd.f32 %v537_v37, %v1130_v28  ;;  %v571_v28 = vmax.f32 %v1153_v58, 0.0 }
 0x108   :  { %v478_v10 = vpop.permute.xlu1 %477  ;;  %v597_v18 = vpop.permute.xlu0 %596 }
 0x109   :  { %v538_v52 = vmul.f32 %v1141_v45, %v478_v10  ;;  %v569_v43 = vmax.f32 %v553_v53, 0.0 }
 0x10b   :  { %v554_v3 = vadd.f32 %v538_v52, %v454_v22 }
 0x10c   :  { %v486_v13 = vpop.permute.xlu1 %485  ;;  %v602_v2 = vpop.permute.xlu0 %601 }
 0x10d   :  { %v540_v12 = vmul.f32 %v1141_v45, %v486_v13  ;;  %v570_v15 = vmax.f32 %v554_v3, 0.0  ;;  %v667_v32 = vmul.f32 %v602_v2, %v571_v28  ;;  %v461_v2 = vadd.f32 %v445_v25, %v1079_v42 }
 0x10e   :  { %v463_v42 = vadd.f32 %v447_v24, %v1091_v48  ;;  %v449_v48 = vmul.f32 %v1120_v14, %v1181_v50 }
 0x10f   :  { %v556_v29 = vadd.f32 %v540_v12, %v456_v17  ;;  %v666_v47 = vmul.f32 %v597_v18, %v570_v15 }
 0x110   :  { %v607_v7 = vpop.permute.xlu0 %606 }
 0x111   :  { %v592_v16 = vpop.permute.xlu1 %591  ;;  %v572_v27 = vmax.f32 %v556_v29, 0.0 }
 0x112   :  { %v665_v26 = vmul.f32 %v592_v16, %v569_v43 }
 0x113   :  { %v668_v30 = vmul.f32 %v607_v7, %v572_v27 }
 0x114   :  { %v680_v49 = vadd.f32 %v665_v26, %v664_v4  ;;  %v612_v51 = vpop.permute.xlu0 %611 }
 0x116   :  { %v681_v36 = vadd.f32 %v680_v49, %v666_v47  ;;  %v490_v56 = vpop.permute.xlu1 %489 }
 0x117   :  { %v541_v17 = vmul.f32 %v1141_v45, %v490_v56 }
 0x118   :  { %v682_v57 = vadd.f32 %v681_v36, %v667_v32  ;;  %v617_v60 = vpop.permute.xlu0 %616 }
 0x119   :  { %v557_v40 = vadd.f32 %v541_v17, %v457_v63 }
 0x11a   :  { %v683_v38 = vadd.f32 %v682_v57, %v668_v30  ;;  %v494_v11 = vpop.permute.xlu1 %493 }
 0x11b   :  { %v573_v58 = vmax.f32 %v557_v40, 0.0  ;;  %v542_v5 = vmul.f32 %v1141_v45, %v494_v11 }
 0x11c   :  { %v622_v59 = vpop.permute.xlu0 %621 }
 0x11d   :  { %v669_v61 = vmul.f32 %v612_v51, %v573_v58  ;;  %v558_v46 = vadd.f32 %v542_v5, %v1168_v0 }
 0x11e   :  { %v498_v41 = vpop.permute.xlu1 %497 }
 0x11f   :  { %v684_v9 = vadd.f32 %v683_v38, %v669_v61  ;;  %v574_v23 = vmax.f32 %v558_v46, 0.0  ;;  %v543_v34 = vmul.f32 %v1141_v45, %v498_v41  ;;  %v465_v46 = vadd.f32 %v449_v48, %v1103_v54 }
 0x120   :  { %v627_v1 = vpop.permute.xlu0 %626  ;;  %v451_v41 = vmul.f32 %v1120_v14, %v1189_v35 }
 0x121   :  { %v670_v37 = vmul.f32 %v617_v60, %v574_v23  ;;  %v559_v10 = vadd.f32 %v543_v34, %v459_v6 }
 0x122   :  { %v502_v18 = vpop.permute.xlu1 %501  ;;  %v467_v50 = vadd.f32 %v451_v41, %v1108_v62  ;;  %v701_v62 = vstv %s1255_s4 }
 0x123   :  { %v685_v52 = vadd.f32 %v684_v9, %v670_v37  ;;  %v575_v22 = vmax.f32 %v559_v10, 0.0  ;;  %v544_v53 = vmul.f32 %v1141_v45, %v502_v18 }
 0x124   :  { %v632_v13 = vpop.permute.xlu0 %631 }
 0x125   :  { %v671_v3 = vmul.f32 %v622_v59, %v575_v22  ;;  %v560_v0 = vadd.f32 %v544_v53, %v1176_v21 }
 0x126   :  { %v506_v19 = vpop.permute.xlu1 %505 }
 0x127   :  { %v686_v12 = vadd.f32 %v685_v52, %v671_v3  ;;  %v576_v39 = vmax.f32 %v560_v0, 0.0  ;;  %v545_v15 = vmul.f32 %v1141_v45, %v506_v19 }
 0x128   :  { %v637_v31 = vpop.permute.xlu0 %636 }
 0x129   :  { %v672_v29 = vmul.f32 %v627_v1, %v576_v39  ;;  %v561_v7 = vadd.f32 %v545_v15, %v461_v2 }
 0x12a   :  { %v510_v43 = vpop.permute.xlu1 %509 }
 0x12b   :  { %v687_v16 = vadd.f32 %v686_v12, %v672_v29  ;;  %v577_v4 = vmax.f32 %v561_v7, 0.0  ;;  %v546_v26 = vmul.f32 %v1141_v45, %v510_v43 }
 0x12c   :  { %v642_v56 = vpop.permute.xlu0 %641 }
 0x12d   :  { %v673_v21 = vmul.f32 %v632_v13, %v577_v4  ;;  %v562_v47 = vadd.f32 %v546_v26, %v1184_v8 }
 0x12e   :  { %v514_v28 = vpop.permute.xlu1 %513 }
 0x12f   :  { %v688_v27 = vadd.f32 %v687_v16, %v673_v21  ;;  %v578_v49 = vmax.f32 %v562_v47, 0.0  ;;  %v547_v51 = vmul.f32 %v1141_v45, %v514_v28 }
 0x130   :  { %v647_v11 = vpop.permute.xlu0 %646 }
 0x131   :  { %v674_v32 = vmul.f32 %v637_v31, %v578_v49  ;;  %v563_v36 = vadd.f32 %v547_v51, %v463_v42 }
 0x132   :  { %v518_v63 = vpop.permute.xlu1 %517 }
 0x133   :  { %v689_v44 = vadd.f32 %v688_v27, %v674_v32  ;;  %v579_v17 = vmax.f32 %v563_v36, 0.0  ;;  %v548_v30 = vmul.f32 %v1141_v45, %v518_v63 }
 0x134   :  { %v657_v25 = vpop.permute.xlu0 %656 }
 0x135   :  { %v675_v57 = vmul.f32 %v642_v56, %v579_v17  ;;  %v564_v60 = vadd.f32 %v548_v30, %v1195_v33 }
 0x136   :  { %v522_v40 = vpop.permute.xlu1 %521 }
 0x137   :  { %v580_v8 = vmax.f32 %v564_v60, 0.0  ;;  %v690_v38 = vadd.f32 %v689_v44, %v675_v57  ;;  %v549_v58 = vmul.f32 %v1141_v45, %v522_v40 }
 0x139   :  { %v676_v55 = vmul.f32 %v647_v11, %v580_v8  ;;  %v565_v33 = vadd.f32 %v549_v58, %v465_v46 }
 0x13a   :  { %v526_v5 = vpop.permute.xlu1 %525 }
 0x13b   :  { %v550_v59 = vmul.f32 %v1141_v45, %v526_v5  ;;  %v691_v61 = vadd.f32 %v690_v38, %v676_v55  ;;  %v581_v37 = vmax.f32 %v565_v33, 0.0 }
 0x13d   :  { %v566_v6 = vadd.f32 %v550_v59, %v1201_v20 }
 0x13e   :  { %v530_v9 = vpop.permute.xlu1 %529 }
 0x13f   :  { %v551_v23 = vmul.f32 %v1141_v45, %v530_v9  ;;  %v582_v34 = vmax.f32 %v566_v6, 0.0 }
 0x141   :  { %v567_v1 = vadd.f32 %v551_v23, %v467_v50  ;;  %v678_v52 = vmul.f32 %v657_v25, %v582_v34 }
 0x143   :  { %v652_v10 = vpop.permute.xlu1 %651  ;;  %v583_v54 = vmax.f32 %v567_v1, 0.0 }
 0x144   :  { %v677_v18 = vmul.f32 %v652_v10, %v581_v37 }
 0x146   :  { %v692_v22 = vadd.f32 %v691_v61, %v677_v18 }
 0x147   :  { %v662_v53 = vpop.permute.xlu1 %661 }
 0x148   :  { %v679_v3 = vmul.f32 %v662_v53, %v583_v54  ;;  %v693_v14 = vadd.f32 %v692_v22, %v678_v52 }
 0x14a   :  { %v694_v35 = vadd.f32 %v693_v14, %v679_v3 }
 0x14c   :  { %v695_v0 = vrot.slane %v694_v35, 4 }
 0x14e   :  { %v696_v20 = vadd.f32 %v695_v0, %v694_v35 }
 0x150   :  { %v697_v13 = vrot.slane %v696_v20, 2 }
 0x152   :  { %v698_v19 = vadd.f32 %v697_v13, %v696_v20 }
 0x154   :  { %v699_v45 = vrot.slane %v698_v19, 1 }
 0x156   :  { %v700_v2 = vadd.f32 %v699_v45, %v698_v19 }
 0x158   :  { %v702_v12 = vadd.f32 %v701_v62, %v700_v2 }
 0x15a   :  { %703 = vst [vmem:[#allocation3] sm:$0x1] %v702_v12 }
 0x15b   :  { %745 = shalt.err (!%p742_p4)
}
 0x15c   :  { %713 = dma.vmem_to_hbm [thread:$0]  %s711_s13, 16, %s1256_s5, [#allocation4]  }
 0x15d   :  { %754 = dma.done.wait [#allocation4], 16  }
 0x15e   :  { %755 = vsyncadd [#allocation4], 4294967280 }
 0x15f   :  { %717 = vsyncpa [#allocation4], 1 }

</bundles_post_ra>
